<compile_context>
chip_gen: v7x
topology: tpu7x:2x2x1
jax: 0.10.0
libtpu: 0.0.40
codegen_flags: <defaults>
</compile_context>

<pallas_src>
import functools

import jax
import jax.numpy as jnp
from jax.experimental import pallas as pl
from jax.experimental.pallas import tpu as pltpu


def _round_up(x, m):
    return ((x + m - 1) // m) * m


def _tpu_config():
    """Generation-aware tiling / VMEM parameters (trace-time, Python only)."""
    kind = ""
    try:
        kind = (getattr(jax.devices()[0], "device_kind", "") or "").lower()
    except Exception:
        pass
    if "v7" in kind:
        cfg = dict(num_cores=2, vmem_bytes=64 << 20, mxu_rows=256, max_rows=512)
    elif "v6" in kind:
        cfg = dict(num_cores=1, vmem_bytes=128 << 20, mxu_rows=256, max_rows=1024)
    else:  # v5e / v5p / unknown: conservative MXU rows, large VMEM
        cfg = dict(num_cores=1, vmem_bytes=128 << 20, mxu_rows=128, max_rows=1024)
    try:  # prefer the exact reported VMEM capacity when available
        vmem = getattr(pltpu.get_tpu_info(), "vmem_capacity_bytes", None)
        if vmem:
            cfg["vmem_bytes"] = int(vmem)
    except Exception:
        pass
    return cfg


def _choose_tm(B, cfg):
    """Batch-tile rows: sublane-aligned for small B, MXU-row aligned for large
    B, split into >=2 parallel grid steps on multi-TensorCore chips (v7x)."""
    mxu, cap, cores = cfg["mxu_rows"], cfg["max_rows"], cfg["num_cores"]
    if B <= mxu:
        tm = _round_up(B, 8)
        if cores > 1 and B >= 16:            # feed the 2nd TensorCore when possible
            tm = _round_up(-(-B // cores), 8)
    else:
        target = -(-B // cores)              # ceil-div across cores
        tm = min(_round_up(target, mxu), cap)
    return max(tm, 8)


def _encoder_kernel(x_ref, w1_ref, b1_ref, w2_ref, b2_ref, wh_ref, bh_ref,
                    out_ref):
    # Three chained MXU matmuls (bf16 operands, f32 accumulation) with f32
    # VPU bias-add / ReLU between them; everything resident in VMEM.
    x = x_ref[...]
    h1 = jnp.dot(x, w1_ref[...], preferred_element_type=jnp.float32) + b1_ref[...]
    h1 = jnp.maximum(h1, 0.0).astype(w2_ref.dtype)
    h2 = jnp.dot(h1, w2_ref[...], preferred_element_type=jnp.float32) + b2_ref[...]
    h2 = jnp.maximum(h2, 0.0).astype(wh_ref.dtype)
    # Fused heads: columns [0:L) are mu, [L:2L) are log_sigma, rest is padding.
    out = jnp.dot(h2, wh_ref[...], preferred_element_type=jnp.float32) + bh_ref[...]
    out_ref[...] = out.astype(out_ref.dtype)


def prepare_encoder_params(params, compute_dtype=jnp.bfloat16):
    """One-time preprocessing: fuse mu/log_sigma heads, pad lane dims to 128,
    cast weights to the MXU compute dtype (biases stay f32)."""
    H1 = params["w1"].shape[1]
    H2 = params["w2"].shape[1]
    L = params["wmu"].shape[1]
    H1p = _round_up(H1, 128)
    H2p = _round_up(H2, 128)
    Op = _round_up(2 * L, 128)

    w1 = jnp.pad(params["w1"], ((0, 0), (0, H1p - H1))).astype(compute_dtype)
    b1 = jnp.pad(params["b1"], ((0, 0), (0, H1p - H1))).astype(jnp.float32)
    w2 = jnp.pad(params["w2"], ((0, H1p - H1), (0, H2p - H2))).astype(compute_dtype)
    b2 = jnp.pad(params["b2"], ((0, 0), (0, H2p - H2))).astype(jnp.float32)
    wh = jnp.pad(jnp.concatenate([params["wmu"], params["wsig"]], axis=1),
                 ((0, H2p - H2), (0, Op - 2 * L))).astype(compute_dtype)
    bh = jnp.pad(jnp.concatenate([params["bmu"], params["bsig"]], axis=1),
                 ((0, 0), (0, Op - 2 * L))).astype(jnp.float32)
    return dict(w1=w1, b1=b1, w2=w2, b2=b2, wh=wh, bh=bh)


@functools.partial(jax.jit, static_argnames=("latent_size",))
def encoder_forward(x, prepped, *, latent_size):
    """VAE encoder forward: x [B, D] f32 + prepared params -> (mu, log_sigma)."""
    B, D = x.shape
    H1p = prepped["w1"].shape[1]
    H2p = prepped["w2"].shape[1]
    Op = prepped["wh"].shape[1]
    L = latent_size
    wdtype = prepped["w1"].dtype

    cfg = _tpu_config()
    tm = _choose_tm(B, cfg)
    Bp = _round_up(B, tm)

    # Only the batch rows are padded; D stays unpadded (full-dim block is legal).
    xp = jnp.pad(x, ((0, Bp - B), (0, 0))).astype(wdtype)

    def full(shape):
        # Replicated operand: same block every grid step -> no redundant DMA.
        return pl.BlockSpec(shape, lambda i: (0,) * len(shape))

    grid_spec = pltpu.PrefetchScalarGridSpec(
        num_scalar_prefetch=0,
        grid=(Bp // tm,),
        in_specs=[
            pl.BlockSpec((tm, D), lambda i: (i, 0)),   # x batch tile
            full((D, H1p)), full((1, H1p)),            # W1 (bf16), b1 (f32)
            full((H1p, H2p)), full((1, H2p)),          # W2, b2
            full((H2p, Op)), full((1, Op)),            # fused head W, b
        ],
        out_specs=pl.BlockSpec((tm, Op), lambda i: (i, 0)),
    )

    # VMEM estimate: double-buffer every pipelined operand (weights included,
    # Pallas allocates pipeline buffers even for constant index_maps), plus
    # live f32 intermediates; 2x headroom, capped at half this generation's
    # physical VMEM so the same wrapper stays safe on v7x (64 MiB).
    wb = jnp.dtype(wdtype).itemsize
    vmem_bytes = (
        2 * tm * D * wb                                   # x tiles
        + 2 * tm * Op * 4                                 # out tiles (f32)
        + 2 * (D * H1p + H1p * H2p + H2p * Op) * wb       # weights (dbl-buffered)
        + 2 * (H1p + H2p + Op) * 4                        # biases (f32)
        + tm * (H1p + H2p) * 4                            # live h1/h2 intermediates
    )
    vmem_limit = int(min(max(2 * vmem_bytes, 8 << 20), cfg["vmem_bytes"] // 2))

    out = pl.pallas_call(
        _encoder_kernel,
        out_shape=jax.ShapeDtypeStruct((Bp, Op), jnp.float32),
        grid_spec=grid_spec,
        compiler_params=pltpu.CompilerParams(
            dimension_semantics=("parallel",),
            vmem_limit_bytes=vmem_limit,
        ),
    )(xp, prepped["w1"], prepped["b1"], prepped["w2"], prepped["b2"],
      prepped["wh"], prepped["bh"])

    mu = out[:B, :L]
    log_sigma = out[:B, L:2 * L]
    return mu, log_sigma


def init_encoder_params(key, input_size, hidden1_size, hidden2_size, latent_size):
    """Deterministic init mimicking torch.nn.Linear (uniform +/- 1/sqrt(fan_in)).

    Weights are stored as [in, out] (i.e. torch weight transposed)."""
    def linear(key, fan_in, fan_out):
        kw, kb = jax.random.split(key)
        bound = 1.0 / jnp.sqrt(fan_in)
        w = jax.random.uniform(kw, (fan_in, fan_out), jnp.float32, -bound, bound)
        b = jax.random.uniform(kb, (1, fan_out), jnp.float32, -bound, bound)
        return w, b

    k1, k2, k3, k4 = jax.random.split(key, 4)
    w1, b1 = linear(k1, input_size, hidden1_size)
    w2, b2 = linear(k2, hidden1_size, hidden2_size)
    wmu, bmu = linear(k3, hidden2_size, latent_size)
    wsig, bsig = linear(k4, hidden2_size, latent_size)
    return dict(w1=w1, b1=b1, w2=w2, b2=b2,
                wmu=wmu, bmu=bmu, wsig=wsig, bsig=bsig)


def encoder_reference(x, p):
    """Pure-JAX f32 reference for correctness checking."""
    h1 = jnp.maximum(x @ p["w1"] + p["b1"], 0.0)
    h2 = jnp.maximum(h1 @ p["w2"] + p["b2"], 0.0)
    return h2 @ p["wmu"] + p["bmu"], h2 @ p["wsig"] + p["bsig"]


if __name__ == "__main__":
    # Small shapes consistent with the module: flattened-image MLP encoder.
    batch = 16
    input_size = 64
    hidden1_size = 128
    hidden2_size = 64
    latent_size = 32

    key = jax.random.PRNGKey(0)
    k_params, k_x = jax.random.split(key)
    params = init_encoder_params(k_params, input_size, hidden1_size,
                                 hidden2_size, latent_size)
    x = jax.random.normal(k_x, (batch, input_size), jnp.float32)

    # One-time weight preprocessing (pad + fuse heads + bf16 cast).
    prepped = prepare_encoder_params(params, compute_dtype=jnp.bfloat16)

    mu, log_sigma = encoder_forward(x, prepped, latent_size=latent_size)
    jax.block_until_ready((mu, log_sigma))

    mu_ref, ls_ref = encoder_reference(x, params)
    assert mu.shape == (batch, latent_size)
    assert log_sigma.shape == (batch, latent_size)
    # bf16 MXU operands with f32 accumulation: loosened tolerances vs f32 ref.
    assert jnp.allclose(mu, mu_ref, atol=3e-2, rtol=3e-2)
    assert jnp.allclose(log_sigma, ls_ref, atol=3e-2, rtol=3e-2)

    print("KERNEL_OK")
</pallas_src>

<mosaic_0001>
module attributes {stable_mosaic.version = 11 : i64} {
  func.func @_encoder_kernel(%arg0: i32, %arg1: memref<16x64xbf16, #tpu.memory_space<vmem>>, %arg2: memref<64x128xbf16, #tpu.memory_space<vmem>>, %arg3: memref<1x128xf32, #tpu.memory_space<vmem>>, %arg4: memref<128x128xbf16, #tpu.memory_space<vmem>>, %arg5: memref<1x128xf32, #tpu.memory_space<vmem>>, %arg6: memref<128x128xbf16, #tpu.memory_space<vmem>>, %arg7: memref<1x128xf32, #tpu.memory_space<vmem>>, %arg8: memref<16x128xf32, #tpu.memory_space<vmem>>) attributes {dimension_semantics = [#tpu.dimension_semantics<parallel>], iteration_bounds = array<i64: 1>, scalar_prefetch = 0 : i64, scratch_operands = 0 : i64, tpu.core_type = #tpu.core_type<tc>, window_params = [{transform_indices = @transform_0, window_bounds = array<i64: 16, 64>}, {pipeline_mode = #tpu.pipeline_mode<synchronous>, transform_indices = @transform_1, window_bounds = array<i64: 64, 128>}, {pipeline_mode = #tpu.pipeline_mode<synchronous>, transform_indices = @transform_2, window_bounds = array<i64: 1, 128>}, {pipeline_mode = #tpu.pipeline_mode<synchronous>, transform_indices = @transform_3, window_bounds = array<i64: 128, 128>}, {pipeline_mode = #tpu.pipeline_mode<synchronous>, transform_indices = @transform_4, window_bounds = array<i64: 1, 128>}, {pipeline_mode = #tpu.pipeline_mode<synchronous>, transform_indices = @transform_5, window_bounds = array<i64: 128, 128>}, {pipeline_mode = #tpu.pipeline_mode<synchronous>, transform_indices = @transform_6, window_bounds = array<i64: 1, 128>}, {transform_indices = @transform_7, window_bounds = array<i64: 16, 128>}]} {
    %c0 = arith.constant 0 : index
    %c0_0 = arith.constant 0 : index
    %0 = vector.load %arg1[%c0, %c0_0] : memref<16x64xbf16, #tpu.memory_space<vmem>>, vector<16x64xbf16>
    %c0_1 = arith.constant 0 : index
    %c0_2 = arith.constant 0 : index
    %1 = vector.load %arg2[%c0_1, %c0_2] : memref<64x128xbf16, #tpu.memory_space<vmem>>, vector<64x128xbf16>
    %cst = arith.constant dense<0.000000e+00> : vector<16x128xf32>
    %2 = tpu.matmul %0, %1, %cst {dimension_numbers = #tpu.dot_dimension_numbers<[1], [0], [0], [1], [0, 0, 1, 1], [], []>} : vector<16x64xbf16>, vector<64x128xbf16>, vector<16x128xf32> -> vector<16x128xf32>
    %c0_3 = arith.constant 0 : index
    %c0_4 = arith.constant 0 : index
    %3 = vector.load %arg3[%c0_3, %c0_4] : memref<1x128xf32, #tpu.memory_space<vmem>>, vector<1x128xf32>
    %4 = vector.broadcast %3 : vector<1x128xf32> to vector<16x128xf32>
    %5 = arith.addf %2, %4 : vector<16x128xf32>
    %cst_5 = arith.constant 0.000000e+00 : f32
    %6 = vector.broadcast %cst_5 : f32 to vector<16x128xf32>
    %7 = arith.maximumf %5, %6 : vector<16x128xf32>
    %8 = arith.truncf %7 : vector<16x128xf32> to vector<16x128xbf16>
    %c0_6 = arith.constant 0 : index
    %c0_7 = arith.constant 0 : index
    %9 = vector.load %arg4[%c0_6, %c0_7] : memref<128x128xbf16, #tpu.memory_space<vmem>>, vector<128x128xbf16>
    %cst_8 = arith.constant dense<0.000000e+00> : vector<16x128xf32>
    %10 = tpu.matmul %8, %9, %cst_8 {dimension_numbers = #tpu.dot_dimension_numbers<[1], [0], [0], [1], [0, 0, 1, 1], [], []>} : vector<16x128xbf16>, vector<128x128xbf16>, vector<16x128xf32> -> vector<16x128xf32>
    %c0_9 = arith.constant 0 : index
    %c0_10 = arith.constant 0 : index
    %11 = vector.load %arg5[%c0_9, %c0_10] : memref<1x128xf32, #tpu.memory_space<vmem>>, vector<1x128xf32>
    %12 = vector.broadcast %11 : vector<1x128xf32> to vector<16x128xf32>
    %13 = arith.addf %10, %12 : vector<16x128xf32>
    %cst_11 = arith.constant 0.000000e+00 : f32
    %14 = vector.broadcast %cst_11 : f32 to vector<16x128xf32>
    %15 = arith.maximumf %13, %14 : vector<16x128xf32>
    %16 = arith.truncf %15 : vector<16x128xf32> to vector<16x128xbf16>
    %c0_12 = arith.constant 0 : index
    %c0_13 = arith.constant 0 : index
    %17 = vector.load %arg6[%c0_12, %c0_13] : memref<128x128xbf16, #tpu.memory_space<vmem>>, vector<128x128xbf16>
    %cst_14 = arith.constant dense<0.000000e+00> : vector<16x128xf32>
    %18 = tpu.matmul %16, %17, %cst_14 {dimension_numbers = #tpu.dot_dimension_numbers<[1], [0], [0], [1], [0, 0, 1, 1], [], []>} : vector<16x128xbf16>, vector<128x128xbf16>, vector<16x128xf32> -> vector<16x128xf32>
    %c0_15 = arith.constant 0 : index
    %c0_16 = arith.constant 0 : index
    %19 = vector.load %arg7[%c0_15, %c0_16] : memref<1x128xf32, #tpu.memory_space<vmem>>, vector<1x128xf32>
    %20 = vector.broadcast %19 : vector<1x128xf32> to vector<16x128xf32>
    %21 = arith.addf %18, %20 : vector<16x128xf32>
    %c0_17 = arith.constant 0 : index
    %c0_18 = arith.constant 0 : index
    %22 = vector.load %arg8[%c0_17, %c0_18] : memref<16x128xf32, #tpu.memory_space<vmem>>, vector<16x128xf32>
    tpu.vector_store %arg8[%c0_17, %c0_18], %21 {strides = array<i32>} : memref<16x128xf32, #tpu.memory_space<vmem>>, vector<16x128xf32>,
    return
  }
  func.func @transform_0(%arg0: i32) -> (i32, i32) {
    %c0_i32 = arith.constant 0 : i32
    %c0_i32_0 = arith.constant 0 : i32
    return %arg0, %c0_i32 : i32, i32
  }
  func.func @transform_1(%arg0: i32) -> (i32, i32) {
    %c0_i32 = arith.constant 0 : i32
    %c0_i32_0 = arith.constant 0 : i32
    %c0_i32_1 = arith.constant 0 : i32
    return %c0_i32, %c0_i32_0 : i32, i32
  }
  func.func @transform_2(%arg0: i32) -> (i32, i32) {
    %c0_i32 = arith.constant 0 : i32
    %c0_i32_0 = arith.constant 0 : i32
    %c0_i32_1 = arith.constant 0 : i32
    return %c0_i32, %c0_i32_0 : i32, i32
  }
  func.func @transform_3(%arg0: i32) -> (i32, i32) {
    %c0_i32 = arith.constant 0 : i32
    %c0_i32_0 = arith.constant 0 : i32
    %c0_i32_1 = arith.constant 0 : i32
    return %c0_i32, %c0_i32_0 : i32, i32
  }
  func.func @transform_4(%arg0: i32) -> (i32, i32) {
    %c0_i32 = arith.constant 0 : i32
    %c0_i32_0 = arith.constant 0 : i32
    %c0_i32_1 = arith.constant 0 : i32
    return %c0_i32, %c0_i32_0 : i32, i32
  }
  func.func @transform_5(%arg0: i32) -> (i32, i32) {
    %c0_i32 = arith.constant 0 : i32
    %c0_i32_0 = arith.constant 0 : i32
    %c0_i32_1 = arith.constant 0 : i32
    return %c0_i32, %c0_i32_0 : i32, i32
  }
  func.func @transform_6(%arg0: i32) -> (i32, i32) {
    %c0_i32 = arith.constant 0 : i32
    %c0_i32_0 = arith.constant 0 : i32
    %c0_i32_1 = arith.constant 0 : i32
    return %c0_i32, %c0_i32_0 : i32, i32
  }
  func.func @transform_7(%arg0: i32) -> (i32, i32) {
    %c0_i32 = arith.constant 0 : i32
    %c0_i32_0 = arith.constant 0 : i32
    return %arg0, %c0_i32 : i32, i32
  }
}

</mosaic_0001>

<bundles_post_ra>
// kernel: encoder_forward.1
= control target key start
LH: loop header
LB: loop body
LE: loop exit
PB: predicated region body
PF: predicated region fallthrough
CT: control target
= control target key end

     0   :  { %12 = vsyncpa [#allocation3], 0  ;;  %s685_s0 = inlined_call_operand.vmem [shape: bf16[16,64], index: 0, kind: input, shape index: {}]   ;;  %s686_s1 = inlined_call_operand.vmem [shape: bf16[64,128], index: 1, kind: input, shape index: {}]   ;;  %s687_s2 = inlined_call_operand.vmem [shape: f32[1,128], index: 2, kind: input, shape index: {}]   ;;  %s688_s3 = inlined_call_operand.hbm [shape: bf16[128,128], index: 3, kind: input, shape index: {}]   ;;  %s689_s4 = inlined_call_operand.vmem [shape: f32[1,128], index: 4, kind: input, shape index: {}]   ;;  %s690_s5 = inlined_call_operand.hbm [shape: bf16[128,128], index: 5, kind: input, shape index: {}]   ;;  %s691_s6 = inlined_call_operand.vmem [shape: f32[1,128], index: 6, kind: input, shape index: {}]   ;;  %s692_s7 = inlined_call_operand.vmem [shape: f32[16,128], index: 7, kind: output, shape index: {}]  }
   0x1   :  { %13 = vsyncpa [#allocation5], 0  ;;  %s559_s24 = smov [#allocation2]   ;;  %s511_s28 = scalar_lea.hbm %s688_s3, 1024 }
   0x2   :  { %s25_s25 = sshll.u32 %s559_s24, 4  ;;  %p512_p0 = scmp.ne.s32.totalorder %s688_s3, %s511_s28  ;;  %s26_s25 = int_to_ptr.vmem [resolvable:$true] %s25_s25 }
   0x3   :  { %p515_p1 = scmp.lt.u32.totalorder %s511_s28, %s688_s3 }
   0x5   :  { %p517_p2 = pnand %p515_p1, %p512_p0 }
   0x7   :  { %520 = shalt.err (!%p517_p2)
}
   0x8   :  { %s521_s10 = scalar_lea.vmem %s26_s25, 1024  ;;  %p526_p4 = scmp.lt.s32.totalorder %s26_s25, %s26_s25 }
   0x9   :  { %p522_p3 = scmp.ne.s32.totalorder %s26_s25, %s521_s10  ;;  %p527_p5 = scmp.lt.s32.totalorder %s521_s10, %s521_s10 }
   0xb   :  { %p528_p6 = por %p527_p5, %p526_p4 }
   0xd   :  { %p529_p7 = pnand %p528_p6, %p522_p3 }
   0xf   :  { %532 = shalt.err (!%p529_p7)
}
  0x10   :  { %s560_s11 = smov 64   ;;  %s561_s12 = smov 4  }
  0x11   :  { %31 = dma.hbm_to_vmem [thread:$0]  %s688_s3, 1024, %s26_s25, [#allocation3], %s560_s11, %s560_s11, %s561_s12  }
  0x12   :  { %s562_s15 = smov [#allocation4]   ;;  %s533_s19 = scalar_lea.hbm %s690_s5, 1024 }
  0x13   :  { %s39_s16 = sshll.u32 %s562_s15, 4  ;;  %p534_p8 = scmp.ne.s32.totalorder %s690_s5, %s533_s19  ;;  %s40_s16 = int_to_ptr.vmem [resolvable:$true] %s39_s16 }
  0x14   :  { %p537_p9 = scmp.lt.u32.totalorder %s533_s19, %s690_s5 }
  0x16   :  { %p539_p10 = pnand %p537_p9, %p534_p8 }
  0x18   :  { %542 = shalt.err (!%p539_p10)
}
  0x19   :  { %s543_s24 = scalar_lea.vmem %s40_s16, 1024  ;;  %p548_p12 = scmp.lt.s32.totalorder %s40_s16, %s40_s16 }
  0x1a   :  { %p544_p11 = scmp.ne.s32.totalorder %s40_s16, %s543_s24  ;;  %p549_p13 = scmp.lt.s32.totalorder %s543_s24, %s543_s24 }
  0x1c   :  { %p550_p0 = por %p549_p13, %p548_p12 }
  0x1e   :  { %p551_p1 = pnand %p550_p0, %p544_p11 }
  0x20   :  { %554 = shalt.err (!%p551_p1)
}
  0x21   :  { %45 = dma.hbm_to_vmem [thread:$0]  %s690_s5, 1024, %s40_s16, [#allocation5], %s560_s11, %s560_s11, %s561_s12  }
  0x22   :  { %555 = dma.done.wait [#allocation3], 1024  }
  0x23   :  { %556 = vsyncadd [#allocation3], 4294966272 }
  0x24   :  { %557 = dma.done.wait [#allocation5], 1024  }
  0x25   :  { %558 = vsyncadd [#allocation5], 4294966272  ;;  %v563_v0 = vmov 0.0   ;;  %vm564_vm0 = vmmov 0   ;;  %v490_v1 = vld [vmem:[%s686_s1] sm:$0xff]   ;;  %v491_v2 = vld [vmem:[%s686_s1 + $0x8] sm:$0xff]  }
  0x26   :  { %432 = vmatprep.subr.bf16.mxu0 %v563_v0  ;;  %440 = vmatprep.mubr.msk.bf16.mxu0 %vm564_vm0, %v563_v0  ;;  %v495_v3 = vld [vmem:[#allocation2] sm:$0xff]   ;;  %v492_v4 = vld [vmem:[%s686_s1 + $0x10] sm:$0xff]   ;;  %v496_v5 = vld [vmem:[#allocation2 + $0x8] sm:$0xff]   ;;  %vm101_vm1 = vcmask 523264  }
  0x27   :  { %444 = vmatprep.subr.bf16.mxu1 %v563_v0  ;;  %460 = vmatprep.mubr.msk.bf16.mxu1 %vm564_vm0, %v563_v0  ;;  %v493_v6 = vld [vmem:[%s686_s1 + $0x18] sm:$0xff]   ;;  %v494_v7 = vld [vmem:[%s685_s0] sm:$0xff]   ;;  %v497_v8 = vld [vmem:[#allocation2 + $0x10] sm:$0xff]  }
  0x28   :  { %433 = vmatpush3.bf16.msra.mxu0 %v490_v1  ;;  %445 = vmatpush3.bf16.msra.mxu1 %v495_v3  ;;  %v498_v9 = vld [vmem:[#allocation2 + $0x18] sm:$0xff]   ;;  %v499_v10 = vld [vmem:[#allocation2 + $0x20] sm:$0xff]   ;;  %v500_v11 = vld [vmem:[#allocation2 + $0x28] sm:$0xff]  }
  0x29   :  { %434 = vmatprep.subr.bf16.mxu0 %v563_v0  ;;  %446 = vmatprep.subr.bf16.mxu1 %v563_v0  ;;  %v501_v12 = vld [vmem:[#allocation2 + $0x30] sm:$0xff]   ;;  %v502_v13 = vld [vmem:[#allocation2 + $0x38] sm:$0xff]   ;;  %v503_v14 = vld [vmem:[#allocation4] sm:$0xff]  }
  0x2a   :  { %v504_v15 = vld [vmem:[#allocation4 + $0x8] sm:$0xff]   ;;  %v505_v16 = vld [vmem:[#allocation4 + $0x10] sm:$0xff]   ;;  %v506_v17 = vld [vmem:[#allocation4 + $0x18] sm:$0xff]  }
  0x2b   :  { %v507_v18 = vld [vmem:[#allocation4 + $0x20] sm:$0xff]   ;;  %v508_v19 = vld [vmem:[#allocation4 + $0x28] sm:$0xff]   ;;  %v509_v30 = vld [vmem:[#allocation4 + $0x30] sm:$0xff]  }
  0x2c   :  { %435 = vmatpush3.bf16.msra.mxu0 %v491_v2  ;;  %447 = vmatpush3.bf16.msra.mxu1 %v496_v5  ;;  %v384_v20 = vld [vmem:[%s687_s2] ss:$0 sm:$0xff]  ;;  %v510_v31 = vld [vmem:[#allocation4 + $0x38] sm:$0xff]  }
  0x2d   :  { %436 = vmatprep.subr.bf16.mxu0 %v563_v0  ;;  %448 = vmatprep.subr.bf16.mxu1 %v563_v0  ;;  %v391_v32 = vld [vmem:[%s689_s4] ss:$0 sm:$0xff] }
  0x2e   :  { %v400_v42 = vld [vmem:[%s691_s6] ss:$0 sm:$0xff] }
  0x30   :  { %437 = vmatpush3.bf16.msra.mxu0 %v492_v4  ;;  %449 = vmatpush3.bf16.msra.mxu1 %v497_v8 }
  0x31   :  { %438 = vmatprep.subr.bf16.mxu0 %v563_v0  ;;  %450 = vmatprep.subr.bf16.mxu1 %v563_v0 }
  0x34   :  { %439 = vmatpush3.bf16.msra.mxu0 %v493_v6  ;;  %451 = vmatpush3.bf16.msra.mxu1 %v498_v9 }
  0x35   :  { %464 = vmatprep.subr.bf16.mxu0 %v563_v0  ;;  %452 = vmatprep.subr.bf16.mxu1 %v563_v0 }
  0x37   :  { %441 = vmatmul.mubr.msk.bf16.vlgmr.msra.gmra.mrb[0].mxu0 %vm101_vm1, %v494_v7 }
  0x38   :  { %480 = vmatprep.mubr.msk.bf16.mxu0 %vm564_vm0, %v563_v0  ;;  %453 = vmatpush3.bf16.msra.mxu1 %v499_v10 }
  0x39   :  { %454 = vmatprep.subr.bf16.mxu1 %v563_v0  ;;  %465 = vmatpush3.bf16.msra.mxu0 %v503_v14 }
  0x3a   :  { %466 = vmatprep.subr.bf16.mxu0 %v563_v0 }
  0x3c   :  { %455 = vmatpush3.bf16.msra.mxu1 %v500_v11 }
  0x3d   :  { %456 = vmatprep.subr.bf16.mxu1 %v563_v0  ;;  %467 = vmatpush3.bf16.msra.mxu0 %v504_v15 }
  0x3e   :  { %468 = vmatprep.subr.bf16.mxu0 %v563_v0 }
  0x40   :  { %457 = vmatpush3.bf16.msra.mxu1 %v501_v12 }
  0x41   :  { %458 = vmatprep.subr.bf16.mxu1 %v563_v0  ;;  %469 = vmatpush3.bf16.msra.mxu0 %v505_v16 }
  0x42   :  { %470 = vmatprep.subr.bf16.mxu0 %v563_v0 }
  0x44   :  { %459 = vmatpush3.bf16.msra.mxu1 %v502_v13 }
  0x45   :  { %471 = vmatpush3.bf16.msra.mxu0 %v506_v17 }
  0x46   :  { %472 = vmatprep.subr.bf16.mxu0 %v563_v0 }
  0x49   :  { %473 = vmatpush3.bf16.msra.mxu0 %v507_v18 }
  0x4a   :  { %474 = vmatprep.subr.bf16.mxu0 %v563_v0 }
  0x4d   :  { %475 = vmatpush3.bf16.msra.mxu0 %v508_v19 }
  0x4e   :  { %476 = vmatprep.subr.bf16.mxu0 %v563_v0 }
  0x51   :  { %477 = vmatpush3.bf16.msra.mxu0 %v509_v30 }
  0x52   :  { %478 = vmatprep.subr.bf16.mxu0 %v563_v0 }
  0x55   :  { %479 = vmatpush3.bf16.msra.mxu0 %v510_v31 }
 0x10a   :  { %v139_v21 = vpop.f32.mrb[0].mxu0 }
 0x10b   :  { %v140_v22 = vadd.f32 %v384_v20, %v139_v21  ;;  %v442_v23 = vpop.f32.mrb[1].mxu0 }
 0x10c   :  { %v142_v24 = vpop.f32.mrb[2].mxu0 }
 0x10d   :  { %v143_v25 = vadd.f32 %v384_v20, %v142_v24  ;;  %v443_v26 = vpop.f32.mrb[3].mxu0  ;;  %v146_v27 = vmax.f32 %v140_v22, 0.0 }
 0x10f   :  { %v147_v28 = vmax.f32 %v143_v25, 0.0 }
 0x111   :  { %v148_v29 = vpack.c.bf16 %v147_v28, %v146_v27 }
 0x113   :  { %461 = vmatmul.mubr.bf16.vlgmr.msra.gmra.mrb[0].mxu1 %v148_v29 }
 0x1e6   :  { %v254_v33 = vpop.f32.mrb[0].mxu1 }
 0x1e7   :  { %v255_v34 = vadd.f32 %v391_v32, %v254_v33  ;;  %v462_v35 = vpop.f32.mrb[1].mxu1 }
 0x1e8   :  { %v257_v36 = vpop.f32.mrb[2].mxu1 }
 0x1e9   :  { %v258_v37 = vadd.f32 %v391_v32, %v257_v36  ;;  %v463_v38 = vpop.f32.mrb[3].mxu1  ;;  %v261_v39 = vmax.f32 %v255_v34, 0.0 }
 0x1eb   :  { %v262_v40 = vmax.f32 %v258_v37, 0.0 }
 0x1ed   :  { %v263_v41 = vpack.c.bf16 %v262_v40, %v261_v39 }
 0x1ef   :  { %481 = vmatmul.mubr.bf16.vlgmr.msra.gmra.mrb[4].mxu0 %v263_v41 }
 0x2c2   :  { %v369_v43 = vpop.f32.mrb[4].mxu0 }
 0x2c3   :  { %v370_v44 = vadd.f32 %v400_v42, %v369_v43  ;;  %v482_v45 = vpop.f32.mrb[5].mxu0 }
 0x2c4   :  { %v372_v46 = vpop.f32.mrb[6].mxu0 }
 0x2c5   :  { %376 = vst [vmem:[%s692_s7] sm:$0xff] %v370_v44  ;;  %v373_v47 = vadd.f32 %v400_v42, %v372_v46  ;;  %v483_v48 = vpop.f32.mrb[7].mxu0 }
 0x2c7   :  { %377 = vst [vmem:[%s692_s7 + $0x8] sm:$0xff] %v373_v47 }
 0x2c8   :  { %382 = vsyncpa [#allocation3], 1 }
 0x2c9   :  { %383 = vsyncpa [#allocation5], 1 }

</bundles_post_ra>
